<compile_context>
chip_gen: v5e
topology: v5e:2x2
jax: 0.10.0
libtpu: 0.0.40
codegen_flags: <defaults>
</compile_context>

<pallas_src>
from functools import partial

import jax
import jax.numpy as jnp
from jax.experimental import pallas as pl
from jax.experimental.pallas import tpu as pltpu


def _round_up(v, m):
    return (v + m - 1) // m * m


# ----------------------------------------------------------------------------
# Fused kernel: conv3x3/s2 (+bias+ReLU) -> 1x1 proj (+bias).  One image / step.
# ----------------------------------------------------------------------------
def _hybrid_embed_kernel(x_ref, wconv_ref, bconv_ref, wproj_ref, bproj_ref,
                         o_ref, *, m_rows, wq, compute_dtype):
    # x_ref    : (1, Mpad, 4*C)  space-to-depth packed padded image (compute dtype)
    # wconv_ref: (4, 4*C, Fp)    per-shift packed 3x3 conv weights (compute dtype)
    # bconv_ref: (1, Fp)         conv bias (f32)
    # wproj_ref: (Fp, Ep)        1x1 projection weight (compute dtype)
    # bproj_ref: (1, Ep)         projection bias (f32)
    # o_ref    : (1, m_rows, Ep) tokens (f32); m_rows = Ho*(Wo+1) incl. 1 junk col
    fp = wconv_ref.shape[-1]
    shifts = (0, 1, wq, wq + 1)          # (dy, dx) shifts on the parity grid
    acc = jnp.zeros((m_rows, fp), jnp.float32)
    # 3x3 / stride-2 conv == 4 shifted GEMMs accumulated in an f32 register acc.
    for s in range(4):                   # static unroll
        slab = x_ref[0, shifts[s]:shifts[s] + m_rows, :]          # (m_rows, 4C)
        acc = acc + jnp.dot(slab, wconv_ref[s],
                            preferred_element_type=jnp.float32)
    feat = jnp.maximum(acc + bconv_ref[...], 0.0)                 # bias+ReLU, f32
    # 1x1 projection fused in-kernel: feature map never hits HBM.
    tok = jnp.dot(feat.astype(compute_dtype), wproj_ref[...],
                  preferred_element_type=jnp.float32) + bproj_ref[...]
    o_ref[0] = tok.astype(o_ref.dtype)


# ----------------------------------------------------------------------------
# One-time parameter packing (transpose / parity-pack / pad to lane-dense dims).
# ----------------------------------------------------------------------------
def prepare_params(params, *, compute_dtype=jnp.float32):
    bw = params["backbone_w"]            # (F, C, 3, 3)
    bb = params["backbone_b"]            # (F,)
    pw = params["proj_w"]                # (E, F, 1, 1)
    pb = params["proj_b"]                # (E,)
    F_dim, C = int(bw.shape[0]), int(bw.shape[1])
    E = int(pw.shape[0])
    Fp = _round_up(F_dim, 128)           # lane-dense feature dim
    Ep = _round_up(E, 128)               # lane-dense embed dim

    # Pack the 3x3 conv weight into 4 blocks of shape (4*C, F), one per
    # (dy, dx) in {0,1}^2 shift of the parity grid.  Channel order inside a
    # block is parity-major ((pi, pj) -> p = 2*pi + pj), input-channel minor.
    blocks = []
    for di in (0, 1):
        for dj in (0, 1):
            parts = []
            for pi in (0, 1):
                for pj in (0, 1):
                    i, j = 2 * di + pi, 2 * dj + pj
                    if i < 3 and j < 3:
                        parts.append(jnp.transpose(bw[:, :, i, j], (1, 0)))  # (C, F)
                    else:
                        parts.append(jnp.zeros((C, F_dim), bw.dtype))
            blocks.append(jnp.concatenate(parts, axis=0))                    # (4C, F)
    wconv = jnp.stack(blocks, axis=0)                                        # (4, 4C, F)
    wconv = jnp.pad(wconv, ((0, 0), (0, 0), (0, Fp - F_dim))).astype(compute_dtype)
    bconv = jnp.pad(bb, (0, Fp - F_dim)).reshape(1, Fp).astype(jnp.float32)
    wproj = jnp.pad(jnp.transpose(pw.reshape(E, F_dim), (1, 0)),
                    ((0, Fp - F_dim), (0, Ep - E))).astype(compute_dtype)
    bproj = jnp.pad(pb, (0, Ep - E)).reshape(1, Ep).astype(jnp.float32)
    return {"wconv": wconv, "bconv": bconv, "wproj": wproj, "bproj": bproj,
            "C": C, "F": F_dim, "E": E, "Fp": Fp, "Ep": Ep,
            "compute_dtype": compute_dtype}


# ----------------------------------------------------------------------------
# Input packing: NCHW -> padded NHWC -> space-to-depth parity planes, flattened
# so each conv tap is a contiguous row shift inside the kernel (no HBM im2col).
# ----------------------------------------------------------------------------
def _pack_input(x, compute_dtype):
    B, C, H, W = x.shape
    Ho = (H + 2 - 3) // 2 + 1
    Wo = (W + 2 - 3) // 2 + 1
    Hq, Wq = Ho + 1, Wo + 1
    xh = jnp.transpose(x, (0, 2, 3, 1))                          # (B, H, W, C)
    xp = jnp.pad(xh, ((0, 0), (1, 1), (1, 1), (0, 0)))           # zero pad=1
    planes = []
    for pi in (0, 1):
        for pj in (0, 1):
            pp = xp[:, pi::2, pj::2, :]
            pp = jnp.pad(pp, ((0, 0), (0, Hq - pp.shape[1]),
                              (0, Wq - pp.shape[2]), (0, 0)))
            planes.append(pp)
    packed = jnp.concatenate(planes, axis=-1)                    # (B, Hq, Wq, 4C)
    packed = packed.reshape(B, Hq * Wq, 4 * C)
    m_rows = Ho * Wq                      # token rows incl. 1 junk column / row
    m_pad = _round_up(m_rows + Wq + 1, 8)  # room for the largest shifted slice
    packed = jnp.pad(packed, ((0, 0), (0, m_pad - Hq * Wq), (0, 0)))
    return packed.astype(compute_dtype), Ho, Wo, Wq, m_rows, m_pad


def _forward(x, prep):
    cdt = prep["compute_dtype"]
    C, E, Fp, Ep = prep["C"], prep["E"], prep["Fp"], prep["Ep"]
    packed, Ho, Wo, Wq, m_rows, m_pad = _pack_input(x, cdt)
    B = x.shape[0]

    bpb = 2 if cdt == jnp.bfloat16 else 4
    flops = B * (4 * 2 * m_rows * (4 * C) * Fp + 2 * m_rows * Fp * Ep)
    bytes_accessed = (packed.size * bpb + prep["wconv"].size * bpb
                      + prep["wproj"].size * bpb + (Fp + Ep) * 4
                      + B * m_rows * Ep * 4)

    # TODO(synk): for large feature maps (e.g. 224x224 inputs) add row tiling of
    # the per-image token block (overlapping windows need manual DMA / pl.ANY);
    # one image per grid step is plenty for these sizes and keeps VMEM tiny.
    out_pad = pl.pallas_call(
        partial(_hybrid_embed_kernel, m_rows=m_rows, wq=Wq, compute_dtype=cdt),
        out_shape=jax.ShapeDtypeStruct((B, m_rows, Ep), jnp.float32),
        grid=(B,),
        in_specs=[
            pl.BlockSpec((1, m_pad, 4 * C), lambda b: (b, 0, 0)),   # packed image
            pl.BlockSpec((4, 4 * C, Fp), lambda b: (0, 0, 0)),      # conv weights
            pl.BlockSpec((1, Fp), lambda b: (0, 0)),                # conv bias
            pl.BlockSpec((Fp, Ep), lambda b: (0, 0)),               # proj weight
            pl.BlockSpec((1, Ep), lambda b: (0, 0)),                # proj bias
        ],
        out_specs=pl.BlockSpec((1, m_rows, Ep), lambda b: (b, 0, 0)),
        compiler_params=pltpu.CompilerParams(
            dimension_semantics=("parallel",)),
        cost_estimate=pl.CostEstimate(flops=flops, transcendentals=0,
                                      bytes_accessed=bytes_accessed),
    )(packed, prep["wconv"], prep["bconv"], prep["wproj"], prep["bproj"])

    # Drop the junk column (width padding of the parity grid) and the channel
    # padding -> (B, num_patches, embed_dim) in flatten(2).transpose(1,2) order.
    out = out_pad.reshape(B, Ho, Wq, Ep)[:, :, :Wo, :E]
    return out.reshape(B, Ho * Wo, E)


def make_hybrid_embed(params, *, compute_dtype=jnp.float32):
    """Returns a jitted forward fn with weights packed once at build time."""
    prep = prepare_params(params, compute_dtype=compute_dtype)

    @jax.jit
    def fwd(x):
        return _forward(x, prep)

    return fwd


# ----------------------------------------------------------------------------
# Pure-JAX reference (for correctness check).
# ----------------------------------------------------------------------------
def hybrid_embed_ref(x, params):
    feat = jax.lax.conv_general_dilated(
        x, params["backbone_w"], window_strides=(2, 2), padding=((1, 1), (1, 1)),
        dimension_numbers=("NCHW", "OIHW", "NCHW"))
    feat = jnp.maximum(feat + params["backbone_b"][None, :, None, None], 0.0)
    out = jax.lax.conv_general_dilated(
        feat, params["proj_w"], window_strides=(1, 1), padding="VALID",
        dimension_numbers=("NCHW", "OIHW", "NCHW"))
    out = out + params["proj_b"][None, :, None, None]
    B, E, H, W = out.shape
    return out.reshape(B, E, H * W).transpose(0, 2, 1)


if __name__ == "__main__":
    # Small shapes consistent with the module:
    #   img_size=16, in_chans=4, backbone feature_dim=32, patch_size=1, embed_dim=64
    B, C, H, W = 2, 4, 16, 16
    F_dim, E = 32, 64

    key = jax.random.PRNGKey(0)
    k1, k2, k3, k4, k5 = jax.random.split(key, 5)
    params = {
        "backbone_w": 0.1 * jax.random.normal(k1, (F_dim, C, 3, 3), jnp.float32),
        "backbone_b": 0.1 * jax.random.normal(k2, (F_dim,), jnp.float32),
        "proj_w": 0.1 * jax.random.normal(k3, (E, F_dim, 1, 1), jnp.float32),
        "proj_b": 0.1 * jax.random.normal(k4, (E,), jnp.float32),
    }
    x = jax.random.normal(k5, (B, C, H, W), jnp.float32)

    ref = jax.block_until_ready(hybrid_embed_ref(x, params))

    # f32 operand path: strict check against the reference.
    fwd_f32 = make_hybrid_embed(params, compute_dtype=jnp.float32)
    out = jax.block_until_ready(fwd_f32(x))
    assert out.shape == (B, (H // 2) * (W // 2), E), out.shape
    assert jnp.allclose(out, ref, atol=1e-4, rtol=1e-4)

    # bf16 operand path (recommended on v6e/v7x MXUs), f32 accumulation.
    fwd_bf16 = make_hybrid_embed(params, compute_dtype=jnp.bfloat16)
    out_bf16 = jax.block_until_ready(fwd_bf16(x))
    assert out_bf16.shape == out.shape
    assert float(jnp.max(jnp.abs(out_bf16 - ref))) < 0.1

    print("KERNEL_OK")
</pallas_src>

<mosaic_0001>
module attributes {stable_mosaic.version = 11 : i64} {
  func.func @_hybrid_embed_kernel(%arg0: i32, %arg1: memref<1x88x16xf32, #tpu.memory_space<vmem>>, %arg2: memref<4x16x128xf32, #tpu.memory_space<vmem>>, %arg3: memref<1x128xf32, #tpu.memory_space<vmem>>, %arg4: memref<128x128xf32, #tpu.memory_space<vmem>>, %arg5: memref<1x128xf32, #tpu.memory_space<vmem>>, %arg6: memref<1x72x128xf32, #tpu.memory_space<vmem>>) attributes {dimension_semantics = [#tpu.dimension_semantics<parallel>], iteration_bounds = array<i64: 2>, scalar_prefetch = 0 : i64, scratch_operands = 0 : i64, tpu.core_type = #tpu.core_type<tc>, window_params = [{transform_indices = @transform_0, window_bounds = array<i64: 1, 88, 16>}, {pipeline_mode = #tpu.pipeline_mode<synchronous>, transform_indices = @transform_1, window_bounds = array<i64: 4, 16, 128>}, {pipeline_mode = #tpu.pipeline_mode<synchronous>, transform_indices = @transform_2, window_bounds = array<i64: 1, 128>}, {pipeline_mode = #tpu.pipeline_mode<synchronous>, transform_indices = @transform_3, window_bounds = array<i64: 128, 128>}, {pipeline_mode = #tpu.pipeline_mode<synchronous>, transform_indices = @transform_4, window_bounds = array<i64: 1, 128>}, {transform_indices = @transform_5, window_bounds = array<i64: 1, 72, 128>}]} {
    %cst = arith.constant 0.000000e+00 : f32
    %0 = vector.broadcast %cst : f32 to vector<72x128xf32>
    %c0 = arith.constant 0 : index
    %c0_0 = arith.constant 0 : index
    %c0_1 = arith.constant 0 : index
    %1 = vector.load %arg1[%c0, %c0_0, %c0_1] : memref<1x88x16xf32, #tpu.memory_space<vmem>>, vector<1x72x16xf32>
    %2 = vector.shape_cast %1 : vector<1x72x16xf32> to vector<72x16xf32>
    %c0_2 = arith.constant 0 : index
    %c0_3 = arith.constant 0 : index
    %c0_4 = arith.constant 0 : index
    %3 = vector.load %arg2[%c0_2, %c0_3, %c0_4] : memref<4x16x128xf32, #tpu.memory_space<vmem>>, vector<1x16x128xf32>
    %4 = vector.shape_cast %3 : vector<1x16x128xf32> to vector<16x128xf32>
    %cst_5 = arith.constant dense<0.000000e+00> : vector<72x128xf32>
    %5 = tpu.matmul %2, %4, %cst_5 {dimension_numbers = #tpu.dot_dimension_numbers<[1], [0], [0], [1], [0, 0, 1, 1], [], []>} : vector<72x16xf32>, vector<16x128xf32>, vector<72x128xf32> -> vector<72x128xf32>
    %6 = arith.addf %0, %5 : vector<72x128xf32>
    %c0_6 = arith.constant 0 : index
    %c1 = arith.constant 1 : index
    %c0_7 = arith.constant 0 : index
    %7 = vector.load %arg1[%c0_6, %c1, %c0_7] : memref<1x88x16xf32, #tpu.memory_space<vmem>>, vector<1x72x16xf32>
    %8 = vector.shape_cast %7 : vector<1x72x16xf32> to vector<72x16xf32>
    %c1_8 = arith.constant 1 : index
    %c0_9 = arith.constant 0 : index
    %c0_10 = arith.constant 0 : index
    %9 = vector.load %arg2[%c1_8, %c0_9, %c0_10] : memref<4x16x128xf32, #tpu.memory_space<vmem>>, vector<1x16x128xf32>
    %10 = vector.shape_cast %9 : vector<1x16x128xf32> to vector<16x128xf32>
    %cst_11 = arith.constant dense<0.000000e+00> : vector<72x128xf32>
    %11 = tpu.matmul %8, %10, %cst_11 {dimension_numbers = #tpu.dot_dimension_numbers<[1], [0], [0], [1], [0, 0, 1, 1], [], []>} : vector<72x16xf32>, vector<16x128xf32>, vector<72x128xf32> -> vector<72x128xf32>
    %12 = arith.addf %6, %11 : vector<72x128xf32>
    %c0_12 = arith.constant 0 : index
    %c9 = arith.constant 9 : index
    %c0_13 = arith.constant 0 : index
    %13 = vector.load %arg1[%c0_12, %c9, %c0_13] : memref<1x88x16xf32, #tpu.memory_space<vmem>>, vector<1x72x16xf32>
    %14 = vector.shape_cast %13 : vector<1x72x16xf32> to vector<72x16xf32>
    %c2 = arith.constant 2 : index
    %c0_14 = arith.constant 0 : index
    %c0_15 = arith.constant 0 : index
    %15 = vector.load %arg2[%c2, %c0_14, %c0_15] : memref<4x16x128xf32, #tpu.memory_space<vmem>>, vector<1x16x128xf32>
    %16 = vector.shape_cast %15 : vector<1x16x128xf32> to vector<16x128xf32>
    %cst_16 = arith.constant dense<0.000000e+00> : vector<72x128xf32>
    %17 = tpu.matmul %14, %16, %cst_16 {dimension_numbers = #tpu.dot_dimension_numbers<[1], [0], [0], [1], [0, 0, 1, 1], [], []>} : vector<72x16xf32>, vector<16x128xf32>, vector<72x128xf32> -> vector<72x128xf32>
    %18 = arith.addf %12, %17 : vector<72x128xf32>
    %c0_17 = arith.constant 0 : index
    %c10 = arith.constant 10 : index
    %c0_18 = arith.constant 0 : index
    %19 = vector.load %arg1[%c0_17, %c10, %c0_18] : memref<1x88x16xf32, #tpu.memory_space<vmem>>, vector<1x72x16xf32>
    %20 = vector.shape_cast %19 : vector<1x72x16xf32> to vector<72x16xf32>
    %c3 = arith.constant 3 : index
    %c0_19 = arith.constant 0 : index
    %c0_20 = arith.constant 0 : index
    %21 = vector.load %arg2[%c3, %c0_19, %c0_20] : memref<4x16x128xf32, #tpu.memory_space<vmem>>, vector<1x16x128xf32>
    %22 = vector.shape_cast %21 : vector<1x16x128xf32> to vector<16x128xf32>
    %cst_21 = arith.constant dense<0.000000e+00> : vector<72x128xf32>
    %23 = tpu.matmul %20, %22, %cst_21 {dimension_numbers = #tpu.dot_dimension_numbers<[1], [0], [0], [1], [0, 0, 1, 1], [], []>} : vector<72x16xf32>, vector<16x128xf32>, vector<72x128xf32> -> vector<72x128xf32>
    %24 = arith.addf %18, %23 : vector<72x128xf32>
    %c0_22 = arith.constant 0 : index
    %c0_23 = arith.constant 0 : index
    %25 = vector.load %arg3[%c0_22, %c0_23] : memref<1x128xf32, #tpu.memory_space<vmem>>, vector<1x128xf32>
    %26 = vector.broadcast %25 : vector<1x128xf32> to vector<72x128xf32>
    %27 = arith.addf %24, %26 : vector<72x128xf32>
    %cst_24 = arith.constant 0.000000e+00 : f32
    %28 = vector.broadcast %cst_24 : f32 to vector<72x128xf32>
    %29 = arith.maximumf %27, %28 : vector<72x128xf32>
    %c0_25 = arith.constant 0 : index
    %c0_26 = arith.constant 0 : index
    %30 = vector.load %arg4[%c0_25, %c0_26] : memref<128x128xf32, #tpu.memory_space<vmem>>, vector<128x128xf32>
    %cst_27 = arith.constant dense<0.000000e+00> : vector<72x128xf32>
    %31 = tpu.matmul %29, %30, %cst_27 {dimension_numbers = #tpu.dot_dimension_numbers<[1], [0], [0], [1], [0, 0, 1, 1], [], []>} : vector<72x128xf32>, vector<128x128xf32>, vector<72x128xf32> -> vector<72x128xf32>
    %c0_28 = arith.constant 0 : index
    %c0_29 = arith.constant 0 : index
    %32 = vector.load %arg5[%c0_28, %c0_29] : memref<1x128xf32, #tpu.memory_space<vmem>>, vector<1x128xf32>
    %33 = vector.broadcast %32 : vector<1x128xf32> to vector<72x128xf32>
    %34 = arith.addf %31, %33 : vector<72x128xf32>
    %c0_30 = arith.constant 0 : index
    %c0_31 = arith.constant 0 : index
    %c0_32 = arith.constant 0 : index
    %35 = vector.load %arg6[%c0_30, %c0_31, %c0_32] : memref<1x72x128xf32, #tpu.memory_space<vmem>>, vector<1x72x128xf32>
    %36 = vector.shape_cast %35 : vector<1x72x128xf32> to vector<72x128xf32>
    %37 = vector.shape_cast %34 : vector<72x128xf32> to vector<1x72x128xf32>
    tpu.vector_store %arg6[%c0_30, %c0_31, %c0_32], %37 {strides = array<i32>} : memref<1x72x128xf32, #tpu.memory_space<vmem>>, vector<1x72x128xf32>,
    return
  }
  func.func @transform_0(%arg0: i32) -> (i32, i32, i32) {
    %c0_i32 = arith.constant 0 : i32
    %c0_i32_0 = arith.constant 0 : i32
    %c0_i32_1 = arith.constant 0 : i32
    return %arg0, %c0_i32, %c0_i32_0 : i32, i32, i32
  }
  func.func @transform_1(%arg0: i32) -> (i32, i32, i32) {
    %c0_i32 = arith.constant 0 : i32
    %c0_i32_0 = arith.constant 0 : i32
    %c0_i32_1 = arith.constant 0 : i32
    %c0_i32_2 = arith.constant 0 : i32
    return %c0_i32, %c0_i32_0, %c0_i32_1 : i32, i32, i32
  }
  func.func @transform_2(%arg0: i32) -> (i32, i32) {
    %c0_i32 = arith.constant 0 : i32
    %c0_i32_0 = arith.constant 0 : i32
    %c0_i32_1 = arith.constant 0 : i32
    return %c0_i32, %c0_i32_0 : i32, i32
  }
  func.func @transform_3(%arg0: i32) -> (i32, i32) {
    %c0_i32 = arith.constant 0 : i32
    %c0_i32_0 = arith.constant 0 : i32
    %c0_i32_1 = arith.constant 0 : i32
    return %c0_i32, %c0_i32_0 : i32, i32
  }
  func.func @transform_4(%arg0: i32) -> (i32, i32) {
    %c0_i32 = arith.constant 0 : i32
    %c0_i32_0 = arith.constant 0 : i32
    %c0_i32_1 = arith.constant 0 : i32
    return %c0_i32, %c0_i32_0 : i32, i32
  }
  func.func @transform_5(%arg0: i32) -> (i32, i32, i32) {
    %c0_i32 = arith.constant 0 : i32
    %c0_i32_0 = arith.constant 0 : i32
    %c0_i32_1 = arith.constant 0 : i32
    return %arg0, %c0_i32, %c0_i32_0 : i32, i32, i32
  }
}

</mosaic_0001>

<bundles_post_ra>
// kernel: fwd.1
= control target key start
LH: loop header
LB: loop body
LE: loop exit
PB: predicated region body
PF: predicated region fallthrough
CT: control target
= control target key end

     0   :  { %s846_s18 = smov 0   ;;  %s1028_s0 = inlined_call_operand.vmem [shape: f32[2,88,16], index: 0, kind: input, shape index: {}]   ;;  %s1029_s1 = inlined_call_operand.vmem [shape: f32[4,16,128], index: 1, kind: input, shape index: {}]   ;;  %s1030_s2 = inlined_call_operand.vmem [shape: f32[1,128], index: 2, kind: input, shape index: {}]   ;;  %s1031_s3 = inlined_call_operand.vmem [shape: f32[128,128], index: 3, kind: input, shape index: {}]   ;;  %s1032_s4 = inlined_call_operand.vmem [shape: f32[1,128], index: 4, kind: input, shape index: {}]   ;;  %s1033_s5 = inlined_call_operand.vmem [shape: f32[2,72,128], index: 5, kind: output, shape index: {}]  }
   0x1 LB: > { %s725_s19 = sadd.s32 4294967295, %s814_s18   ;;  %p729_p0 = scmp.ge.s32.totalorder %s814_s18, 1  ;;  %s814_s18 = sphi %s846_s18, %s15_s18  }
   0x2   : > { %p187_p1 = scmp.lt.s32.totalorder %s814_s18, 3 }
   0x4   : > { %p188_p2 = pnand %p729_p0, %p187_p1 }
   0x5   : > { %p215_p3 = scmp.lt.s32.totalorder (!%p188_p2), %s725_s19, 1 }
   0x6   : > { %191 = sbr.rel (%p188_p2) target bundleno = 376 (0x178), region = 40 }
   0xb   : > { %v733_v0 = vld [vmem:[%s1029_s1 + $0x18] sm:$0xff]  ;;  %v732_v1 = vld [vmem:[%s1029_s1 + $0x10] sm:$0xff]  ;;  %v235_v2 = vld [vmem:[%s1029_s1 + $0x8] sm:$0xff]  ;;  %s1035_s19 = smov (!%p215_p3, %s725_s19), 1  ;;  %vm248_vm0 = vcmask 130048  }
   0xc   : > { %776 = vmatpush.msra.mxu1 %v733_v0  ;;  %777 = vmatpush.msra.mxu2 %v733_v0  ;;  %v753_v3 = vld [vmem:[%s1029_s1 + $0x28] sm:$0xff]  ;;  %v764_v4 = vld [vmem:[%s1029_s1 + $0x38] sm:$0xff]  ;;  %v234_v5 = vld [vmem:[%s1029_s1] sm:$0xff]  ;;  %s796_s9 = smul.u32 88, %s1035_s19 }
   0xd   : > { %290 = vmatpush.msra.mxu0 %v733_v0  ;;  %v752_v6 = vld [vmem:[%s1029_s1 + $0x20] sm:$0xff]  ;;  %v763_v7 = vld [vmem:[%s1029_s1 + $0x30] sm:$0xff]  ;;  %536 = vmatpush.msra.mxu3 %v764_v4  ;;  %v612_v36 = vld [vmem:[%s1031_s3 + $0x78] sm:$0xff]  ;;  %s797_s28 = smul.u32 72, %s1035_s19 }
   0xe   : > { %778 = vmatpush.msra.mxu1 %v732_v1  ;;  %779 = vmatpush.msra.mxu2 %v732_v1  ;;  %s884_s14 = scalar_lea.vmem %s1028_s0, %s796_s9  ;;  %v611_v37 = vld [vmem:[%s1031_s3 + $0x70] sm:$0xff]  ;;  %v610_v38 = vld [vmem:[%s1031_s3 + $0x68] sm:$0xff]  ;;  %v609_v39 = vld [vmem:[%s1031_s3 + $0x60] sm:$0xff] }
   0xf   : > { %291 = vmatpush.msra.mxu0 %v732_v1  ;;  %v240_v8 = vld [vmem:[%s884_s14 + $0x21] sm:$0xff]  ;;  %v243_v9 = vld [vmem:[%s884_s14 + $0x39] sm:$0xff]  ;;  %537 = vmatpush.msra.mxu3 %v763_v7  ;;  %v483_v10 = vld [vmem:[%s884_s14 + $0xa] sm:$0xff]  ;;  %s224_s8 = scalar_lea.vmem %s1033_s5, %s797_s28 }
  0x10   : > { %361 = vmatpush.msrb.mxu1 %v235_v2  ;;  %444 = vmatpush.msrb.mxu2 %v753_v3  ;;  %v236_v11 = vld [vmem:[%s884_s14 + $0x1] sm:$0xff]  ;;  %v241_v12 = vld [vmem:[%s884_s14 + $0x29] sm:$0xff]  ;;  %v484_v14 = vld [vmem:[%s884_s14 + $0x12] sm:$0xff] }
  0x11   : > { %738 = vmatmul.msk.f32.vlgmr.msra.gmra.mxu1 %vm248_vm0, %v240_v8  ;;  %741 = vmatmul.msk.f32.vlgmr.msra.gmra.mxu2 %vm248_vm0, %v243_v9  ;;  %v244_v13 = vld [vmem:[%s884_s14 + $0x41] sm:$0xff]  ;;  %v391_v15 = vld [vmem:[%s884_s14 + $0x9] sm:$0xff]  ;;  %v242_v16 = vld [vmem:[%s884_s14 + $0x31] sm:$0xff] }
  0x12   : > { %362 = vmatpush.msrb.mxu1 %v234_v5  ;;  %445 = vmatpush.msrb.mxu2 %v752_v6  ;;  %v485_v17 = vld [vmem:[%s884_s14 + $0x1a] sm:$0xff]  ;;  %v392_v18 = vld [vmem:[%s884_s14 + $0x11] sm:$0xff]  ;;  %v486_v20 = vld [vmem:[%s884_s14 + $0x22] sm:$0xff] }
  0x13   : > { %765 = vmatmul.msk.f32.vlgmr.msra.gmra.mxu3 %vm248_vm0, %v483_v10  ;;  %734 = vmatmul.msk.f32.vlgmr.msra.gmra.mxu0 %vm248_vm0, %v236_v11  ;;  %v225_v19 = vld [vmem:[%s884_s14] sm:$0xff]  ;;  %v226_v22 = vld [vmem:[%s884_s14 + $0x8] sm:$0xff]  ;;  %v227_v24 = vld [vmem:[%s884_s14 + $0x10] sm:$0xff] }
  0x14   : > { %v393_v21 = vld [vmem:[%s884_s14 + $0x19] sm:$0xff]  ;;  %v487_v23 = vld [vmem:[%s884_s14 + $0x2a] sm:$0xff]  ;;  %v490_v29 = vld [vmem:[%s884_s14 + $0x42] sm:$0xff]  ;;  %617 = vmatpush.msrb.mxu0 %v612_v36  ;;  %780 = vmatpush.msrb.mxu3 %v612_v36 }
  0x15   : > { %v488_v25 = vld [vmem:[%s884_s14 + $0x32] sm:$0xff]  ;;  %v489_v27 = vld [vmem:[%s884_s14 + $0x3a] sm:$0xff]  ;;  %v230_v30 = vld [vmem:[%s884_s14 + $0x28] sm:$0xff] }
  0x16   : > { %v228_v26 = vld [vmem:[%s884_s14 + $0x18] sm:$0xff]  ;;  %v229_v28 = vld [vmem:[%s884_s14 + $0x20] sm:$0xff]  ;;  %v491_v31 = vld [vmem:[%s884_s14 + $0x4a] sm:$0xff]  ;;  %618 = vmatpush.msrb.mxu0 %v611_v37  ;;  %781 = vmatpush.msrb.mxu3 %v611_v37 }
  0x17   : > { %v231_v32 = vld [vmem:[%s884_s14 + $0x30] sm:$0xff]  ;;  %v232_v33 = vld [vmem:[%s884_s14 + $0x38] sm:$0xff]  ;;  %v233_v35 = vld [vmem:[%s884_s14 + $0x40] sm:$0xff] }
  0x18   : > { %v399_v34 = vld [vmem:[%s884_s14 + $0x49] sm:$0xff]  ;;  %619 = vmatpush.msrb.mxu0 %v610_v38  ;;  %782 = vmatpush.msrb.mxu3 %v610_v38  ;;  %v608_v40 = vld [vmem:[%s1031_s3 + $0x58] sm:$0xff]  ;;  %v605_v43 = vld [vmem:[%s1031_s3 + $0x40] sm:$0xff] }
  0x19   : > { %739 = vmatmul.msk.f32.gmra.mxu1 %vm248_vm0, %v241_v12  ;;  %742 = vmatmul.msk.f32.gmra.mxu2 %vm248_vm0, %v244_v13  ;;  %v607_v41 = vld [vmem:[%s1031_s3 + $0x50] sm:$0xff]  ;;  %v606_v42 = vld [vmem:[%s1031_s3 + $0x48] sm:$0xff]  ;;  %v604_v44 = vld [vmem:[%s1031_s3 + $0x38] sm:$0xff] }
  0x1a   : > { %620 = vmatpush.msrb.mxu0 %v609_v39  ;;  %783 = vmatpush.msrb.mxu3 %v609_v39  ;;  %v603_v45 = vld [vmem:[%s1031_s3 + $0x30] sm:$0xff]  ;;  %v602_v46 = vld [vmem:[%s1031_s3 + $0x28] sm:$0xff]  ;;  %v601_v47 = vld [vmem:[%s1031_s3 + $0x20] sm:$0xff] }
  0x1b   : > { %766 = vmatmul.msk.f32.gmra.mxu3 %vm248_vm0, %v484_v14  ;;  %735 = vmatmul.msk.f32.gmra.mxu0 %vm248_vm0, %v391_v15  ;;  %v600_v48 = vld [vmem:[%s1031_s3 + $0x18] sm:$0xff]  ;;  %v599_v49 = vld [vmem:[%s1031_s3 + $0x10] sm:$0xff]  ;;  %v598_v50 = vld [vmem:[%s1031_s3 + $0x8] sm:$0xff] }
  0x1c   : > { %621 = vmatpush.msrb.mxu0 %v608_v40  ;;  %784 = vmatpush.msrb.mxu3 %v608_v40  ;;  %v597_v52 = vld [vmem:[%s1031_s3] sm:$0xff] }
  0x1d   : > { %v1005_v1 = vld [vmem:[%s1030_s2] ss:$0 sm:$0xff] }
  0x1e   : > { %622 = vmatpush.msrb.mxu0 %v607_v41  ;;  %785 = vmatpush.msrb.mxu3 %v607_v41 }
  0x20   : > { %623 = vmatpush.msrb.mxu0 %v606_v42  ;;  %786 = vmatpush.msrb.mxu3 %v606_v42 }
  0x21   : > { %740 = vmatmul.msk.f32.gmra.mxu1 %vm248_vm0, %v242_v16  ;;  %754 = vmatmul.msk.f32.vlgmr.msrb.gmra.mxu2 %vm248_vm0, %v391_v15 }
  0x22   : > { %624 = vmatpush.msrb.mxu0 %v605_v43  ;;  %787 = vmatpush.msrb.mxu3 %v605_v43 }
  0x23   : > { %767 = vmatmul.msk.f32.gmra.mxu3 %vm248_vm0, %v485_v17  ;;  %736 = vmatmul.msk.f32.gmra.mxu0 %vm248_vm0, %v392_v18 }
  0x24   : > { %625 = vmatpush.msrb.mxu0 %v604_v44  ;;  %788 = vmatpush.msrb.mxu3 %v604_v44 }
  0x26   : > { %626 = vmatpush.msrb.mxu0 %v603_v45  ;;  %789 = vmatpush.msrb.mxu3 %v603_v45 }
  0x28   : > { %627 = vmatpush.msrb.mxu0 %v602_v46  ;;  %790 = vmatpush.msrb.mxu3 %v602_v46 }
  0x29   : > { %743 = vmatmul.msk.f32.vlgmr.msrb.gmra.mxu1 %vm248_vm0, %v225_v19  ;;  %755 = vmatmul.msk.f32.gmra.mxu2 %vm248_vm0, %v392_v18 }
  0x2a   : > { %628 = vmatpush.msrb.mxu0 %v601_v47  ;;  %791 = vmatpush.msrb.mxu3 %v601_v47 }
  0x2b   : > { %768 = vmatmul.msk.f32.gmra.mxu3 %vm248_vm0, %v486_v20  ;;  %737 = vmatmul.msk.f32.gmra.mxu0 %vm248_vm0, %v393_v21 }
  0x2c   : > { %629 = vmatpush.msrb.mxu0 %v600_v48  ;;  %792 = vmatpush.msrb.mxu3 %v600_v48 }
  0x2e   : > { %630 = vmatpush.msrb.mxu0 %v599_v49  ;;  %793 = vmatpush.msrb.mxu3 %v599_v49 }
  0x30   : > { %631 = vmatpush.msrb.mxu0 %v598_v50  ;;  %794 = vmatpush.msrb.mxu3 %v598_v50 }
  0x31   : > { %744 = vmatmul.msk.f32.gmra.mxu1 %vm248_vm0, %v226_v22  ;;  %756 = vmatmul.msk.f32.gmra.mxu2 %vm248_vm0, %v393_v21 }
  0x32   : > { %632 = vmatpush.msrb.mxu0 %v597_v52  ;;  %795 = vmatpush.msrb.mxu3 %v597_v52 }
  0x33   : > { %769 = vmatmul.msk.f32.gmra.mxu3 %vm248_vm0, %v487_v23 }
  0x39   : > { %745 = vmatmul.msk.f32.gmra.mxu1 %vm248_vm0, %v227_v24  ;;  %757 = vmatmul.msk.f32.gmra.mxu2 %vm248_vm0, %v240_v8 }
  0x3b   : > { %770 = vmatmul.msk.f32.gmra.mxu3 %vm248_vm0, %v488_v25 }
  0x41   : > { %746 = vmatmul.msk.f32.gmra.mxu1 %vm248_vm0, %v228_v26  ;;  %758 = vmatmul.msk.f32.gmra.mxu2 %vm248_vm0, %v241_v12 }
  0x43   : > { %771 = vmatmul.msk.f32.gmra.mxu3 %vm248_vm0, %v489_v27 }
  0x49   : > { %747 = vmatmul.msk.f32.gmra.mxu1 %vm248_vm0, %v229_v28  ;;  %759 = vmatmul.msk.f32.gmra.mxu2 %vm248_vm0, %v242_v16 }
  0x4b   : > { %772 = vmatmul.msk.f32.gmra.mxu3 %vm248_vm0, %v490_v29 }
  0x51   : > { %748 = vmatmul.msk.f32.gmra.mxu1 %vm248_vm0, %v230_v30  ;;  %760 = vmatmul.msk.f32.gmra.mxu2 %vm248_vm0, %v243_v9 }
  0x53   : > { %773 = vmatmul.msk.f32.gmra.mxu3 %vm248_vm0, %v491_v31 }
  0x59   : > { %749 = vmatmul.msk.f32.gmra.mxu1 %vm248_vm0, %v231_v32  ;;  %761 = vmatmul.msk.f32.gmra.mxu2 %vm248_vm0, %v244_v13 }
  0x61   : > { %750 = vmatmul.msk.f32.gmra.mxu1 %vm248_vm0, %v232_v33  ;;  %762 = vmatmul.msk.f32.gmra.mxu2 %vm248_vm0, %v399_v34 }
  0x69   : > { %751 = vmatmul.msk.f32.gmra.mxu1 %vm248_vm0, %v233_v35 }
  0x8e   : > { %v305_v51 = vpop.f32.mrf.mxu1 }
  0x90   : > { %v293_v58 = vpop.f32.mrf.mxu0 }
  0x94   : > { %v998_v53 = vpop.f32.mrf.mxu2 }
  0x96   : > { %v308_v54 = vpop.f32.mrf.mxu1  ;;  %v539_v55 = vpop.f32.mrf.mxu3 }
  0x98   : > { %v296_v63 = vpop.f32.mrf.mxu0 }
  0x9c   : > { %v1000_v56 = vpop.f32.mrf.mxu2 }
  0x9e   : > { %v311_v57 = vpop.f32.mrf.mxu1  ;;  %v542_v59 = vpop.f32.mrf.mxu3 }
  0xa0   : > { %v299_v10 = vpop.f32.mrf.mxu0 }
  0xa4   : > { %v447_v60 = vpop.f32.mrf.mxu2 }
  0xa6   : > { %v364_v61 = vpop.f32.mrf.mxu1  ;;  %v545_v4 = vpop.f32.mrf.mxu3 }
  0xa7   : > { %v365_v62 = vadd.f32 %v364_v61, %v293_v58 }
  0xa8   : > { %v302_v20 = vpop.f32.mrf.mxu0 }
  0xa9   : > { %v474_v0 = vadd.f32 %v447_v60, %v365_v62 }
  0xab   : > { %v566_v2 = vadd.f32 %v539_v55, %v474_v0 }
  0xac   : > { %v450_v3 = vpop.f32.mrf.mxu2 }
  0xad   : > { %v579_v5 = vadd.f32 %v1005_v1, %v566_v2 }
  0xae   : > { %v367_v6 = vpop.f32.mrf.mxu1  ;;  %v548_v15 = vpop.f32.mrf.mxu3 }
  0xaf   : > { %v588_v7 = vmax.f32 %v579_v5, 0.0  ;;  %v368_v8 = vadd.f32 %v367_v6, %v296_v63 }
  0xb1   : > { %v475_v9 = vadd.f32 %v450_v3, %v368_v8  ;;  %633 = vmatmul.f32.vlgmr.msrb.gmra.mxu0 %v588_v7 }
  0xb3   : > { %v567_v11 = vadd.f32 %v542_v59, %v475_v9 }
  0xb4   : > { %v453_v12 = vpop.f32.mrf.mxu2 }
  0xb5   : > { %v580_v13 = vadd.f32 %v1005_v1, %v567_v11 }
  0xb6   : > { %v370_v14 = vpop.f32.mrf.mxu1  ;;  %v551_v26 = vpop.f32.mrf.mxu3 }
  0xb7   : > { %v371_v16 = vadd.f32 %v370_v14, %v299_v10  ;;  %v589_v17 = vmax.f32 %v580_v13, 0.0 }
  0xb9   : > { %v476_v18 = vadd.f32 %v453_v12, %v371_v16  ;;  %636 = vmatmul.f32.gmra.mxu0 %v589_v17 }
  0xbb   : > { %v568_v19 = vadd.f32 %v545_v4, %v476_v18 }
  0xbc   : > { %v456_v21 = vpop.f32.mrf.mxu2 }
  0xbd   : > { %v581_v22 = vadd.f32 %v1005_v1, %v568_v19 }
  0xbe   : > { %v373_v23 = vpop.f32.mrf.mxu1  ;;  %v554_v35 = vpop.f32.mrf.mxu3 }
  0xbf   : > { %v374_v24 = vadd.f32 %v373_v23, %v302_v20  ;;  %v590_v25 = vmax.f32 %v581_v22, 0.0 }
  0xc1   : > { %v477_v27 = vadd.f32 %v456_v21, %v374_v24  ;;  %639 = vmatmul.f32.gmra.mxu0 %v590_v25 }
  0xc3   : > { %v569_v28 = vadd.f32 %v548_v15, %v477_v27 }
  0xc4   : > { %v459_v29 = vpop.f32.mrf.mxu2 }
  0xc5   : > { %v582_v30 = vadd.f32 %v1005_v1, %v569_v28 }
  0xc6   : > { %v376_v31 = vpop.f32.mrf.mxu1  ;;  %v557_v45 = vpop.f32.mrf.mxu3 }
  0xc7   : > { %v377_v32 = vadd.f32 %v376_v31, %v305_v51  ;;  %v591_v33 = vmax.f32 %v582_v30, 0.0 }
  0xc9   : > { %v478_v34 = vadd.f32 %v459_v29, %v377_v32  ;;  %642 = vmatmul.f32.gmra.mxu0 %v591_v33 }
  0xcb   : > { %v570_v36 = vadd.f32 %v551_v26, %v478_v34 }
  0xcc   : > { %v462_v37 = vpop.f32.mrf.mxu2 }
  0xcd   : > { %v583_v38 = vadd.f32 %v1005_v1, %v570_v36 }
  0xce   : > { %v379_v39 = vpop.f32.mrf.mxu1  ;;  %v560_v59 = vpop.f32.mrf.mxu3 }
  0xcf   : > { %v380_v40 = vadd.f32 %v379_v39, %v308_v54  ;;  %v592_v41 = vmax.f32 %v583_v38, 0.0 }
  0xd1   : > { %v479_v42 = vadd.f32 %v462_v37, %v380_v40  ;;  %645 = vmatmul.f32.gmra.mxu0 %v592_v41 }
  0xd3   : > { %v571_v43 = vadd.f32 %v554_v35, %v479_v42 }
  0xd4   : > { %v465_v44 = vpop.f32.mrf.mxu2 }
  0xd5   : > { %v584_v46 = vadd.f32 %v1005_v1, %v571_v43 }
  0xd6   : > { %v382_v47 = vpop.f32.mrf.mxu1  ;;  %v563_v4 = vpop.f32.mrf.mxu3 }
  0xd7   : > { %v383_v48 = vadd.f32 %v382_v47, %v311_v57  ;;  %v593_v49 = vmax.f32 %v584_v46, 0.0 }
  0xd9   : > { %v480_v50 = vadd.f32 %v465_v44, %v383_v48  ;;  %648 = vmatmul.f32.gmra.mxu0 %v593_v49 }
  0xdb   : > { %v572_v51 = vadd.f32 %v557_v45, %v480_v50 }
  0xdc   : > { %v468_v52 = vpop.f32.mrf.mxu2 }
  0xdd   : > { %v585_v55 = vadd.f32 %v1005_v1, %v572_v51 }
  0xde   : > { %v385_v58 = vpop.f32.mrf.mxu1 }
  0xdf   : > { %v386_v54 = vadd.f32 %v385_v58, %v998_v53  ;;  %v594_v60 = vmax.f32 %v585_v55, 0.0  ;;  %v807_v53 = vld [vmem:[%s1032_s4] ss:$0 sm:$0xff] }
  0xe1   : > { %v481_v61 = vadd.f32 %v468_v52, %v386_v54  ;;  %651 = vmatmul.f32.gmra.mxu0 %v594_v60 }
  0xe3   : > { %v573_v62 = vadd.f32 %v560_v59, %v481_v61 }
  0xe4   : > { %v471_v57 = vpop.f32.mrf.mxu2 }
  0xe5   : > { %v586_v63 = vadd.f32 %v1005_v1, %v573_v62 }
  0xe6   : > { %v388_v0 = vpop.f32.mrf.mxu1 }
  0xe7   : > { %v389_v2 = vadd.f32 %v388_v0, %v1000_v56  ;;  %v595_v3 = vmax.f32 %v586_v63, 0.0 }
  0xe9   : > { %v482_v5 = vadd.f32 %v471_v57, %v389_v2  ;;  %654 = vmatmul.f32.gmra.mxu0 %v595_v3 }
  0xeb   : > { %v574_v6 = vadd.f32 %v563_v4, %v482_v5 }
  0xed   : > { %v587_v7 = vadd.f32 %v1005_v1, %v574_v6 }
  0xef   : > { %v596_v8 = vmax.f32 %v587_v7, 0.0 }
  0xf1   : > { %657 = vmatmul.f32.vlgmr.msrb.gmra.mxu3 %v596_v8 }
 0x12e   : > { %v634_v9 = vpop.f32.mrf.mxu0 }
 0x12f   : > { %v635_v56 = vadd.f32 %v807_v53, %v634_v9 }
 0x131   : > { %661 = vst [vmem:[%s224_s8] sm:$0xff] %v635_v56 }
 0x136   : > { %v637_v10 = vpop.f32.mrf.mxu0 }
 0x137   : > { %v638_v11 = vadd.f32 %v807_v53, %v637_v10 }
 0x139   : > { %662 = vst [vmem:[%s224_s8 + $0x8] sm:$0xff] %v638_v11 }
 0x13e   : > { %v640_v12 = vpop.f32.mrf.mxu0 }
 0x13f   : > { %v641_v13 = vadd.f32 %v807_v53, %v640_v12 }
 0x141   : > { %663 = vst [vmem:[%s224_s8 + $0x10] sm:$0xff] %v641_v13 }
 0x146   : > { %v643_v1 = vpop.f32.mrf.mxu0 }
 0x147   : > { %v644_v14 = vadd.f32 %v807_v53, %v643_v1 }
 0x149   : > { %664 = vst [vmem:[%s224_s8 + $0x18] sm:$0xff] %v644_v14 }
 0x14e   : > { %v646_v15 = vpop.f32.mrf.mxu0 }
 0x14f   : > { %v647_v16 = vadd.f32 %v807_v53, %v646_v15 }
 0x151   : > { %665 = vst [vmem:[%s224_s8 + $0x20] sm:$0xff] %v647_v16 }
 0x156   : > { %v649_v17 = vpop.f32.mrf.mxu0 }
 0x157   : > { %v650_v18 = vadd.f32 %v807_v53, %v649_v17 }
 0x159   : > { %666 = vst [vmem:[%s224_s8 + $0x28] sm:$0xff] %v650_v18 }
 0x15e   : > { %v652_v19 = vpop.f32.mrf.mxu0 }
 0x15f   : > { %v653_v20 = vadd.f32 %v807_v53, %v652_v19 }
 0x161   : > { %667 = vst [vmem:[%s224_s8 + $0x30] sm:$0xff] %v653_v20 }
 0x166   : > { %v655_v21 = vpop.f32.mrf.mxu0 }
 0x167   : > { %v656_v22 = vadd.f32 %v807_v53, %v655_v21 }
 0x169   : > { %668 = vst [vmem:[%s224_s8 + $0x38] sm:$0xff] %v656_v22 }
 0x174   : > { %v658_v23 = vpop.f32.mrf.mxu3 }
 0x175   : > { %v659_v24 = vadd.f32 %v807_v53, %v658_v23 }
 0x177   : > { %669 = vst [vmem:[%s224_s8 + $0x40] sm:$0xff] %v659_v24 }
 0x178 PF: > { %s15_s18 = sadd.s32 1, %s814_s18  }
 0x179   : > { %p12_p4 = scmp.ge.s32.totalorder %s15_s18, 4  }
 0x17b   :  { %14 = sbr.rel (!%p12_p4) target bundleno = 1 (0x1), region = 73 }

</bundles_post_ra>
